<compile_context>
chip_gen: v5e
topology: v5e:2x2
jax: 0.10.0
libtpu: 0.0.40
codegen_flags: <defaults>
</compile_context>

<pallas_src>
import functools

import jax
import jax.numpy as jnp
from jax.experimental import pallas as pl
from jax.experimental.pallas import tpu as pltpu


def _round_up(x, m):
    return ((x + m - 1) // m) * m


def _mlp_kernel(xs_ref, xn_ref, act_ref, w1s_ref, w1n_ref, w1a_ref,
                b1_ref, w2_ref, b2_ref, o_ref):
    # xs_ref/xn_ref : (TM, E)   act_ref: (TM, 1) int32
    # w1s_ref/w1n_ref: (E, DHp) w1a_ref: (A, DHp) f32
    # b1_ref: (1, DHp) f32      w2_ref: (DHp, DOp)   b2_ref: (1, DOp) f32
    # o_ref : (TM, DOp) f32     (DHp, DOp are 128-lane padded)

    # ---- layer 1: f32 accumulation on the MXU ----
    h = jnp.dot(xs_ref[...], w1s_ref[...], preferred_element_type=jnp.float32)
    h = h + jnp.dot(xn_ref[...], w1n_ref[...], preferred_element_type=jnp.float32)

    # one_hot(action) @ W1_action realized as an unrolled select-gather of the
    # (tiny, VMEM-resident) W1_action rows — pure VPU work, no zero-multiplies
    # on the MXU and no one-hot materialized in HBM.
    a = act_ref[...]                                   # (TM, 1) int32
    w1a = w1a_ref[...]                                 # (A, DHp) f32
    num_actions = w1a.shape[0]
    for k in range(num_actions):                       # A is small & static
        sel = (a == k).astype(jnp.float32)             # (TM, 1)
        h = h + sel * w1a[k:k + 1, :]                  # broadcast FMA

    h = jnp.maximum(h + b1_ref[...], 0.0)              # bias + ReLU in f32

    # ---- layer 2 ----
    out = jnp.dot(h.astype(w2_ref.dtype), w2_ref[...],
                  preferred_element_type=jnp.float32)
    o_ref[...] = (out + b2_ref[...]).astype(o_ref.dtype)


@functools.partial(jax.jit, static_argnames=("tm",))
def _fused_mlp(xs, xn, act, w1s, w1n, w1a, b1, w2, b2, *, tm):
    """xs/xn: (Np, E), act: (Np, 1) int32, Np % tm == 0. Returns (Np, DOp) f32."""
    n_pad, e = xs.shape
    num_actions, dh_pad = w1a.shape
    d_out_pad = w2.shape[1]
    grid = (n_pad // tm,)
    return pl.pallas_call(
        _mlp_kernel,
        out_shape=jax.ShapeDtypeStruct((n_pad, d_out_pad), jnp.float32),
        grid_spec=pltpu.PrefetchScalarGridSpec(
            num_scalar_prefetch=0,
            grid=grid,
            in_specs=[
                pl.BlockSpec((tm, e), lambda i: (i, 0)),            # state rows
                pl.BlockSpec((tm, e), lambda i: (i, 0)),            # next-state rows
                pl.BlockSpec((tm, 1), lambda i: (i, 0)),            # action ids
                pl.BlockSpec((e, dh_pad), lambda i: (0, 0)),        # W1_state  (resident)
                pl.BlockSpec((e, dh_pad), lambda i: (0, 0)),        # W1_next   (resident)
                pl.BlockSpec((num_actions, dh_pad), lambda i: (0, 0)),  # W1_action
                pl.BlockSpec((1, dh_pad), lambda i: (0, 0)),        # b1
                pl.BlockSpec((dh_pad, d_out_pad), lambda i: (0, 0)),# W2        (resident)
                pl.BlockSpec((1, d_out_pad), lambda i: (0, 0)),     # b2
            ],
            out_specs=pl.BlockSpec((tm, d_out_pad), lambda i: (i, 0)),
        ),
        compiler_params=pltpu.CompilerParams(
            dimension_semantics=("parallel",),   # shard row tiles across TCs (v7x)
        ),
    )(xs, xn, act, w1s, w1n, w1a, b1, w2, b2)


class VQEncoderPallas:
    """JAX/Pallas port of the PyTorch VQEncoder module."""

    _D_HIDDEN = 64
    _LANE = 128
    _ROW_ALIGN = 16      # covers f32 (8) and bf16 (16) sublane packing
    _MAX_TM = 512        # production row tile (multiple of 128 -> fills v5e MXU)

    def __init__(self, num_actions, embedding_size, code_dim, key,
                 compute_dtype=jnp.float32):
        self.num_actions = num_actions
        self.embedding_size = embedding_size
        self.code_dim = code_dim
        self.compute_dtype = compute_dtype

        d_in = 2 * embedding_size + num_actions
        dh = self._D_HIDDEN

        k1, k2, k3, k4 = jax.random.split(key, 4)
        # Canonical params, mimicking nn.Linear default init (uniform +-1/sqrt(fan_in)),
        # stored (in, out) so the math is x @ W (identical to PyTorch's x @ W.T).
        lim1 = 1.0 / jnp.sqrt(d_in)
        lim2 = 1.0 / jnp.sqrt(dh)
        self.w1 = jax.random.uniform(k1, (d_in, dh), jnp.float32, -lim1, lim1)
        self.b1 = jax.random.uniform(k2, (dh,), jnp.float32, -lim1, lim1)
        self.w2 = jax.random.uniform(k3, (dh, code_dim), jnp.float32, -lim2, lim2)
        self.b2 = jax.random.uniform(k4, (code_dim,), jnp.float32, -lim2, lim2)

        # ---- kernel-layout params (split by input segment + lane padded), built once ----
        dh_pad = _round_up(dh, self._LANE)            # 64  -> 128 (lane-dense hidden)
        d_out_pad = _round_up(code_dim, self._LANE)   # 16  -> 128 (lane-dense stores)
        self._dh_pad = dh_pad
        self._d_out_pad = d_out_pad

        e, a = embedding_size, num_actions
        pad_h = dh_pad - dh
        w1_state = self.w1[:e]                 # concat order: state | one_hot | next_state
        w1_action = self.w1[e:e + a]
        w1_next = self.w1[e + a:]

        self.k_w1s = jnp.pad(w1_state, ((0, 0), (0, pad_h))).astype(compute_dtype)
        self.k_w1n = jnp.pad(w1_next, ((0, 0), (0, pad_h))).astype(compute_dtype)
        self.k_w1a = jnp.pad(w1_action, ((0, 0), (0, pad_h))).astype(jnp.float32)
        self.k_b1 = jnp.pad(self.b1, (0, pad_h)).reshape(1, dh_pad).astype(jnp.float32)
        self.k_w2 = jnp.pad(self.w2, ((0, pad_h), (0, d_out_pad - code_dim))
                            ).astype(compute_dtype)
        self.k_b2 = jnp.pad(self.b2, (0, d_out_pad - code_dim)
                            ).reshape(1, d_out_pad).astype(jnp.float32)

    def __call__(self, state_embedding, action, next_state_embedding):
        # state_embedding, next_state_embedding: (B, T, E) float32; action: (B, T) int
        b, t, e = state_embedding.shape
        n = b * t

        xs = state_embedding.reshape(n, e).astype(self.compute_dtype)
        xn = next_state_embedding.reshape(n, e).astype(self.compute_dtype)
        act = action.reshape(n, 1).astype(jnp.int32)

        # Row tiling: one grid step for small N, tm=512 tiles for large N.
        n_pad = _round_up(n, self._ROW_ALIGN)
        tm = min(n_pad, self._MAX_TM)
        n_final = _round_up(n_pad, tm)
        if n_final != n:
            pad = n_final - n
            xs = jnp.pad(xs, ((0, pad), (0, 0)))
            xn = jnp.pad(xn, ((0, pad), (0, 0)))
            act = jnp.pad(act, ((0, pad), (0, 0)))   # index 0 is valid; rows sliced off

        out = _fused_mlp(xs, xn, act,
                         self.k_w1s, self.k_w1n, self.k_w1a,
                         self.k_b1, self.k_w2, self.k_b2, tm=tm)
        return out[:n, :self.code_dim].reshape(b, t, self.code_dim)


def _reference(model, state_embedding, action, next_state_embedding):
    """Pure-JAX f32 reference (mirrors the PyTorch module exactly)."""
    a = jax.nn.one_hot(action, model.num_actions, dtype=jnp.float32)
    x = jnp.concatenate((state_embedding, a, next_state_embedding), axis=2)
    h = jnp.maximum(x @ model.w1 + model.b1, 0.0)
    return h @ model.w2 + model.b2


if __name__ == "__main__":
    key = jax.random.PRNGKey(0)
    k_params, k_s, k_a, k_ns = jax.random.split(key, 4)

    B, T = 2, 8
    EMBED = 32
    NUM_ACTIONS = 4
    CODE_DIM = 16

    state_embedding = jax.random.normal(k_s, (B, T, EMBED), jnp.float32)
    next_state_embedding = jax.random.normal(k_ns, (B, T, EMBED), jnp.float32)
    action = jax.random.randint(k_a, (B, T), 0, NUM_ACTIONS, dtype=jnp.int32)

    # --- f32 compute path (default), tight correctness check ---
    model = VQEncoderPallas(NUM_ACTIONS, EMBED, CODE_DIM, k_params)
    latent = jax.block_until_ready(model(state_embedding, action, next_state_embedding))
    ref = _reference(model, state_embedding, action, next_state_embedding)
    assert latent.shape == (B, T, CODE_DIM), latent.shape
    assert jnp.allclose(latent, ref, atol=1e-5, rtol=1e-5), "f32 mismatch vs reference"

    # --- bf16 operand path (v6e/v7x MXU-native), f32 accumulation, loose check ---
    model_bf16 = VQEncoderPallas(NUM_ACTIONS, EMBED, CODE_DIM, k_params,
                                 compute_dtype=jnp.bfloat16)
    latent_bf16 = jax.block_until_ready(
        model_bf16(state_embedding, action, next_state_embedding))
    assert jnp.allclose(latent_bf16, ref, atol=5e-2, rtol=5e-2), "bf16 mismatch vs reference"

    # --- larger batch to exercise the multi-tile grid path (tm=512) ---
    Bl, Tl = 8, 128
    sL = jax.random.normal(k_s, (Bl, Tl, EMBED), jnp.float32)
    nsL = jax.random.normal(k_ns, (Bl, Tl, EMBED), jnp.float32)
    aL = jax.random.randint(k_a, (Bl, Tl), 0, NUM_ACTIONS, dtype=jnp.int32)
    latL = jax.block_until_ready(model(sL, aL, nsL))
    refL = _reference(model, sL, aL, nsL)
    assert jnp.allclose(latL, refL, atol=1e-5, rtol=1e-5), "tiled f32 mismatch vs reference"

    print("KERNEL_OK")
</pallas_src>

<mosaic_0001>
module attributes {stable_mosaic.version = 11 : i64} {
  func.func @_mlp_kernel(%arg0: i32, %arg1: memref<16x32xf32, #tpu.memory_space<vmem>>, %arg2: memref<16x32xf32, #tpu.memory_space<vmem>>, %arg3: memref<16x1xi32, #tpu.memory_space<vmem>>, %arg4: memref<32x128xf32, #tpu.memory_space<vmem>>, %arg5: memref<32x128xf32, #tpu.memory_space<vmem>>, %arg6: memref<4x128xf32, #tpu.memory_space<vmem>>, %arg7: memref<1x128xf32, #tpu.memory_space<vmem>>, %arg8: memref<128x128xf32, #tpu.memory_space<vmem>>, %arg9: memref<1x128xf32, #tpu.memory_space<vmem>>, %arg10: memref<16x128xf32, #tpu.memory_space<vmem>>) attributes {dimension_semantics = [#tpu.dimension_semantics<parallel>], iteration_bounds = array<i64: 1>, scalar_prefetch = 0 : i64, scratch_operands = 0 : i64, tpu.core_type = #tpu.core_type<tc>, window_params = [{transform_indices = @transform_0, window_bounds = array<i64: 16, 32>}, {transform_indices = @transform_1, window_bounds = array<i64: 16, 32>}, {transform_indices = @transform_2, window_bounds = array<i64: 16, 1>}, {pipeline_mode = #tpu.pipeline_mode<synchronous>, transform_indices = @transform_3, window_bounds = array<i64: 32, 128>}, {pipeline_mode = #tpu.pipeline_mode<synchronous>, transform_indices = @transform_4, window_bounds = array<i64: 32, 128>}, {pipeline_mode = #tpu.pipeline_mode<synchronous>, transform_indices = @transform_5, window_bounds = array<i64: 4, 128>}, {pipeline_mode = #tpu.pipeline_mode<synchronous>, transform_indices = @transform_6, window_bounds = array<i64: 1, 128>}, {pipeline_mode = #tpu.pipeline_mode<synchronous>, transform_indices = @transform_7, window_bounds = array<i64: 128, 128>}, {pipeline_mode = #tpu.pipeline_mode<synchronous>, transform_indices = @transform_8, window_bounds = array<i64: 1, 128>}, {transform_indices = @transform_9, window_bounds = array<i64: 16, 128>}]} {
    %c0 = arith.constant 0 : index
    %c0_0 = arith.constant 0 : index
    %0 = vector.load %arg1[%c0, %c0_0] : memref<16x32xf32, #tpu.memory_space<vmem>>, vector<16x32xf32>
    %c0_1 = arith.constant 0 : index
    %c0_2 = arith.constant 0 : index
    %1 = vector.load %arg4[%c0_1, %c0_2] : memref<32x128xf32, #tpu.memory_space<vmem>>, vector<32x128xf32>
    %cst = arith.constant dense<0.000000e+00> : vector<16x128xf32>
    %2 = tpu.matmul %0, %1, %cst {dimension_numbers = #tpu.dot_dimension_numbers<[1], [0], [0], [1], [0, 0, 1, 1], [], []>} : vector<16x32xf32>, vector<32x128xf32>, vector<16x128xf32> -> vector<16x128xf32>
    %c0_3 = arith.constant 0 : index
    %c0_4 = arith.constant 0 : index
    %3 = vector.load %arg2[%c0_3, %c0_4] : memref<16x32xf32, #tpu.memory_space<vmem>>, vector<16x32xf32>
    %c0_5 = arith.constant 0 : index
    %c0_6 = arith.constant 0 : index
    %4 = vector.load %arg5[%c0_5, %c0_6] : memref<32x128xf32, #tpu.memory_space<vmem>>, vector<32x128xf32>
    %cst_7 = arith.constant dense<0.000000e+00> : vector<16x128xf32>
    %5 = tpu.matmul %3, %4, %cst_7 {dimension_numbers = #tpu.dot_dimension_numbers<[1], [0], [0], [1], [0, 0, 1, 1], [], []>} : vector<16x32xf32>, vector<32x128xf32>, vector<16x128xf32> -> vector<16x128xf32>
    %6 = arith.addf %2, %5 : vector<16x128xf32>
    %c0_8 = arith.constant 0 : index
    %c0_9 = arith.constant 0 : index
    %7 = vector.load %arg3[%c0_8, %c0_9] : memref<16x1xi32, #tpu.memory_space<vmem>>, vector<16x1xi32>
    %c0_10 = arith.constant 0 : index
    %c0_11 = arith.constant 0 : index
    %8 = vector.load %arg6[%c0_10, %c0_11] : memref<4x128xf32, #tpu.memory_space<vmem>>, vector<4x128xf32>
    %c0_i32 = arith.constant 0 : i32
    %9 = vector.broadcast %c0_i32 : i32 to vector<16x1xi32>
    %10 = arith.cmpi eq, %7, %9 : vector<16x1xi32>
    %11 = arith.extui %10 : vector<16x1xi1> to vector<16x1xi32>
    %12 = arith.sitofp %11 : vector<16x1xi32> to vector<16x1xf32>
    %13 = vector.extract_strided_slice %8 {offsets = [0, 0], sizes = [1, 128], strides = [1, 1]} : vector<4x128xf32> to vector<1x128xf32>
    %14 = vector.broadcast %12 : vector<16x1xf32> to vector<16x128xf32>
    %15 = vector.broadcast %13 : vector<1x128xf32> to vector<16x128xf32>
    %16 = arith.mulf %14, %15 : vector<16x128xf32>
    %17 = arith.addf %6, %16 : vector<16x128xf32>
    %c1_i32 = arith.constant 1 : i32
    %18 = vector.broadcast %c1_i32 : i32 to vector<16x1xi32>
    %19 = arith.cmpi eq, %7, %18 : vector<16x1xi32>
    %20 = arith.extui %19 : vector<16x1xi1> to vector<16x1xi32>
    %21 = arith.sitofp %20 : vector<16x1xi32> to vector<16x1xf32>
    %22 = vector.extract_strided_slice %8 {offsets = [1, 0], sizes = [1, 128], strides = [1, 1]} : vector<4x128xf32> to vector<1x128xf32>
    %23 = vector.broadcast %21 : vector<16x1xf32> to vector<16x128xf32>
    %24 = vector.broadcast %22 : vector<1x128xf32> to vector<16x128xf32>
    %25 = arith.mulf %23, %24 : vector<16x128xf32>
    %26 = arith.addf %17, %25 : vector<16x128xf32>
    %c2_i32 = arith.constant 2 : i32
    %27 = vector.broadcast %c2_i32 : i32 to vector<16x1xi32>
    %28 = arith.cmpi eq, %7, %27 : vector<16x1xi32>
    %29 = arith.extui %28 : vector<16x1xi1> to vector<16x1xi32>
    %30 = arith.sitofp %29 : vector<16x1xi32> to vector<16x1xf32>
    %31 = vector.extract_strided_slice %8 {offsets = [2, 0], sizes = [1, 128], strides = [1, 1]} : vector<4x128xf32> to vector<1x128xf32>
    %32 = vector.broadcast %30 : vector<16x1xf32> to vector<16x128xf32>
    %33 = vector.broadcast %31 : vector<1x128xf32> to vector<16x128xf32>
    %34 = arith.mulf %32, %33 : vector<16x128xf32>
    %35 = arith.addf %26, %34 : vector<16x128xf32>
    %c3_i32 = arith.constant 3 : i32
    %36 = vector.broadcast %c3_i32 : i32 to vector<16x1xi32>
    %37 = arith.cmpi eq, %7, %36 : vector<16x1xi32>
    %38 = arith.extui %37 : vector<16x1xi1> to vector<16x1xi32>
    %39 = arith.sitofp %38 : vector<16x1xi32> to vector<16x1xf32>
    %40 = vector.extract_strided_slice %8 {offsets = [3, 0], sizes = [1, 128], strides = [1, 1]} : vector<4x128xf32> to vector<1x128xf32>
    %41 = vector.broadcast %39 : vector<16x1xf32> to vector<16x128xf32>
    %42 = vector.broadcast %40 : vector<1x128xf32> to vector<16x128xf32>
    %43 = arith.mulf %41, %42 : vector<16x128xf32>
    %44 = arith.addf %35, %43 : vector<16x128xf32>
    %c0_12 = arith.constant 0 : index
    %c0_13 = arith.constant 0 : index
    %45 = vector.load %arg7[%c0_12, %c0_13] : memref<1x128xf32, #tpu.memory_space<vmem>>, vector<1x128xf32>
    %46 = vector.broadcast %45 : vector<1x128xf32> to vector<16x128xf32>
    %47 = arith.addf %44, %46 : vector<16x128xf32>
    %cst_14 = arith.constant 0.000000e+00 : f32
    %48 = vector.broadcast %cst_14 : f32 to vector<16x128xf32>
    %49 = arith.maximumf %47, %48 : vector<16x128xf32>
    %c0_15 = arith.constant 0 : index
    %c0_16 = arith.constant 0 : index
    %50 = vector.load %arg8[%c0_15, %c0_16] : memref<128x128xf32, #tpu.memory_space<vmem>>, vector<128x128xf32>
    %cst_17 = arith.constant dense<0.000000e+00> : vector<16x128xf32>
    %51 = tpu.matmul %49, %50, %cst_17 {dimension_numbers = #tpu.dot_dimension_numbers<[1], [0], [0], [1], [0, 0, 1, 1], [], []>} : vector<16x128xf32>, vector<128x128xf32>, vector<16x128xf32> -> vector<16x128xf32>
    %c0_18 = arith.constant 0 : index
    %c0_19 = arith.constant 0 : index
    %52 = vector.load %arg9[%c0_18, %c0_19] : memref<1x128xf32, #tpu.memory_space<vmem>>, vector<1x128xf32>
    %53 = vector.broadcast %52 : vector<1x128xf32> to vector<16x128xf32>
    %54 = arith.addf %51, %53 : vector<16x128xf32>
    %c0_20 = arith.constant 0 : index
    %c0_21 = arith.constant 0 : index
    %55 = vector.load %arg10[%c0_20, %c0_21] : memref<16x128xf32, #tpu.memory_space<vmem>>, vector<16x128xf32>
    tpu.vector_store %arg10[%c0_20, %c0_21], %54 {strides = array<i32>} : memref<16x128xf32, #tpu.memory_space<vmem>>, vector<16x128xf32>,
    return
  }
  func.func @transform_0(%arg0: i32) -> (i32, i32) {
    %c0_i32 = arith.constant 0 : i32
    %c0_i32_0 = arith.constant 0 : i32
    return %arg0, %c0_i32 : i32, i32
  }
  func.func @transform_1(%arg0: i32) -> (i32, i32) {
    %c0_i32 = arith.constant 0 : i32
    %c0_i32_0 = arith.constant 0 : i32
    return %arg0, %c0_i32 : i32, i32
  }
  func.func @transform_2(%arg0: i32) -> (i32, i32) {
    %c0_i32 = arith.constant 0 : i32
    %c0_i32_0 = arith.constant 0 : i32
    return %arg0, %c0_i32 : i32, i32
  }
  func.func @transform_3(%arg0: i32) -> (i32, i32) {
    %c0_i32 = arith.constant 0 : i32
    %c0_i32_0 = arith.constant 0 : i32
    %c0_i32_1 = arith.constant 0 : i32
    return %c0_i32, %c0_i32_0 : i32, i32
  }
  func.func @transform_4(%arg0: i32) -> (i32, i32) {
    %c0_i32 = arith.constant 0 : i32
    %c0_i32_0 = arith.constant 0 : i32
    %c0_i32_1 = arith.constant 0 : i32
    return %c0_i32, %c0_i32_0 : i32, i32
  }
  func.func @transform_5(%arg0: i32) -> (i32, i32) {
    %c0_i32 = arith.constant 0 : i32
    %c0_i32_0 = arith.constant 0 : i32
    %c0_i32_1 = arith.constant 0 : i32
    return %c0_i32, %c0_i32_0 : i32, i32
  }
  func.func @transform_6(%arg0: i32) -> (i32, i32) {
    %c0_i32 = arith.constant 0 : i32
    %c0_i32_0 = arith.constant 0 : i32
    %c0_i32_1 = arith.constant 0 : i32
    return %c0_i32, %c0_i32_0 : i32, i32
  }
  func.func @transform_7(%arg0: i32) -> (i32, i32) {
    %c0_i32 = arith.constant 0 : i32
    %c0_i32_0 = arith.constant 0 : i32
    %c0_i32_1 = arith.constant 0 : i32
    return %c0_i32, %c0_i32_0 : i32, i32
  }
  func.func @transform_8(%arg0: i32) -> (i32, i32) {
    %c0_i32 = arith.constant 0 : i32
    %c0_i32_0 = arith.constant 0 : i32
    %c0_i32_1 = arith.constant 0 : i32
    return %c0_i32, %c0_i32_0 : i32, i32
  }
  func.func @transform_9(%arg0: i32) -> (i32, i32) {
    %c0_i32 = arith.constant 0 : i32
    %c0_i32_0 = arith.constant 0 : i32
    return %arg0, %c0_i32 : i32, i32
  }
}

</mosaic_0001>

<bundles_post_ra>
// kernel: _fused_mlp.1
= control target key start
LH: loop header
LB: loop body
LE: loop exit
PB: predicated region body
PF: predicated region fallthrough
CT: control target
= control target key end

     0   :  { %14 = vsyncpa [#allocation3], 0  ;;  %s670_s0 = inlined_call_operand.vmem [shape: f32[16,32], index: 0, kind: input, shape index: {}]   ;;  %s671_s1 = inlined_call_operand.hbm [shape: f32[16,32], index: 1, kind: input, shape index: {}]   ;;  %s672_s2 = inlined_call_operand.vmem [shape: s32[16,1], index: 2, kind: input, shape index: {}]   ;;  %s673_s3 = inlined_call_operand.hbm [shape: f32[32,128], index: 3, kind: input, shape index: {}]   ;;  %s674_s4 = inlined_call_operand.hbm [shape: f32[32,128], index: 4, kind: input, shape index: {}]   ;;  %s675_s5 = inlined_call_operand.hbm [shape: f32[4,128], index: 5, kind: input, shape index: {}]   ;;  %s676_s6 = inlined_call_operand.vmem [shape: f32[1,128], index: 6, kind: input, shape index: {}]   ;;  %s677_s7 = inlined_call_operand.hbm [shape: f32[128,128], index: 7, kind: input, shape index: {}]   ;;  %s678_s8 = inlined_call_operand.vmem [shape: f32[1,128], index: 8, kind: input, shape index: {}]   ;;  %s679_s9 = inlined_call_operand.hbm [shape: f32[16,128], index: 9, kind: output, shape index: {}]  }
   0x1   :  { %15 = vsyncpa [#allocation6], 0 }
   0x2   :  { %16 = vsyncpa [#allocation9], 0 }
   0x3   :  { %17 = vsyncpa [#allocation4], 0  ;;  %s39_s11 = sshll.u32 %s673_s3, 4  ;;  %s555_s12 = smov [#allocation5]   ;;  %s40_s11 = int_to_ptr.hbm [resolvable:$true] %s39_s11 }
   0x4   :  { %s41_s13 = sshll.u32 %s555_s12, 4  ;;  %s66_s16 = sshll.u32 %s675_s5, 4  ;;  %s42_s13 = int_to_ptr.vmem [resolvable:$true] %s41_s13  ;;  %s67_s16 = int_to_ptr.hbm [resolvable:$true] %s66_s16 }
   0x5   :  { %s556_s17 = smov 128   ;;  %s557_s18 = smov 8  }
   0x6   :  { %47 = dma.hbm_to_vmem [thread:$0]  %s40_s11, 512, %s42_s13, [#allocation6], %s556_s17, %s556_s17, %s557_s18  }
   0x7   :  { %s558_s19 = smov [#allocation8]   ;;  %s24_s3 = sshll.u32 %s671_s1, 4  ;;  %s25_s3 = int_to_ptr.hbm [resolvable:$true] %s24_s3 }
   0x8   :  { %s68_s20 = sshll.u32 %s558_s19, 4  ;;  %s52_s5 = sshll.u32 %s674_s4, 4  ;;  %s69_s20 = int_to_ptr.vmem [resolvable:$true] %s68_s20  ;;  %s53_s5 = int_to_ptr.hbm [resolvable:$true] %s52_s5 }
   0x9   :  { %71 = dma.hbm_to_vmem [thread:$0]  %s67_s16, 64, %s69_s20, [#allocation9]  }
   0xa   :  { %s559_s25 = smov [#allocation2]   ;;  %s560_s27 = smov [#allocation7]  }
   0xb   :  { %s26_s26 = sshll.u32 %s559_s25, 4  ;;  %s54_s28 = sshll.u32 %s560_s27, 4  ;;  %s27_s26 = int_to_ptr.vmem [resolvable:$true] %s26_s26  ;;  %s55_s28 = int_to_ptr.vmem [resolvable:$true] %s54_s28 }
   0xc   :  { %32 = dma.hbm_to_vmem [thread:$0]  %s25_s3, 256, %s27_s26, [#allocation3], %s556_s17, %s556_s17, %s557_s18  }
   0xd   :  { %s78_s1 = sshll.u32 %s677_s7, 4  ;;  %s561_s4 = smov [#allocation10]   ;;  %s79_s1 = int_to_ptr.hbm [resolvable:$true] %s78_s1 }
   0xe   :  { %60 = dma.hbm_to_vmem [thread:$0]  %s53_s5, 512, %s55_s28, [#allocation6], %s556_s17, %s556_s17, %s557_s18  }
   0xf   :  { %s80_s10 = sshll.u32 %s561_s4, 4  ;;  %s81_s10 = int_to_ptr.vmem [resolvable:$true] %s80_s10 }
  0x10   :  { %86 = dma.hbm_to_vmem [thread:$0]  %s79_s1, 2048, %s81_s10, [#allocation9], %s556_s17, %s556_s17, %s557_s18  }
  0x11   :  { %547 = dma.done.wait [#allocation3], 256  }
  0x12   :  { %548 = vsyncadd [#allocation3], 4294967040 }
  0x13   :  { %549 = dma.done.wait [#allocation6], 1024  }
  0x14   :  { %550 = vsyncadd [#allocation6], 4294966272 }
  0x15   :  { %551 = dma.done.wait [#allocation9], 2112  }
  0x16   :  { %552 = vsyncadd [#allocation9], 4294965184  ;;  %v562_v0 = vmov 0   ;;  %v120_v1 = vld [vmem:[#allocation7 + $0x18] sm:$0xff]  ;;  %v119_v3 = vld [vmem:[#allocation7 + $0x10] sm:$0xff]  ;;  %vm121_vm0 = vcmask 261120  }
  0x17   :  { %379 = vset.pattern.permute.xlu0 %v562_v0  ;;  %390 = vset.pattern.permute.xlu1 %v562_v0  ;;  %v114_v2 = vld [vmem:[#allocation5 + $0x18] sm:$0xff]  ;;  %v113_v4 = vld [vmem:[#allocation5 + $0x10] sm:$0xff]  ;;  %v118_v5 = vld [vmem:[#allocation7 + $0x8] sm:$0xff]  ;;  %v563_v13 = vmov 0.0   ;;  %s564_s21 = smov [#allocation11]   ;;  %s326_s24 = sshll.u32 %s679_s9, 4  ;;  %s327_s24 = int_to_ptr.hbm [resolvable:$true] %s326_s24 }
  0x18   :  { %140 = vmatpush.msra.mxu0 %v120_v1  ;;  %169 = vmatpush.msra.mxu1 %v114_v2  ;;  %v112_v6 = vld [vmem:[#allocation5 + $0x8] sm:$0xff]  ;;  %v117_v7 = vld [vmem:[#allocation7] sm:$0xff]  ;;  %v180_v8 = vld [vmem:[%s672_s2] sm:$0xff]  ;;  %s324_s22 = sshll.u32 %s564_s21, 4  ;;  %s325_s22 = int_to_ptr.vmem [resolvable:$true] %s324_s22 }
  0x19   :  { %v181_v9 = vld [vmem:[%s672_s2 + $0x8] sm:$0xff]  ;;  %v111_v10 = vld [vmem:[#allocation5] sm:$0xff]  ;;  %v115_v11 = vld [vmem:[#allocation2] sm:$0xff]  ;;  %vm183_vm1 = vcmp.eq.s32.totalorder %v180_v8, 0  ;;  %vm225_vm3 = vcmp.eq.s32.totalorder %v180_v8, 2  ;;  %vm204_vm5 = vcmp.eq.s32.totalorder %v180_v8, 1 }
  0x1a   :  { %141 = vmatpush.msra.mxu0 %v119_v3  ;;  %170 = vmatpush.msra.mxu1 %v113_v4  ;;  %vm184_vm2 = vcmp.eq.s32.totalorder %v181_v9, 0  ;;  %vm226_vm4 = vcmp.eq.s32.totalorder %v181_v9, 2  ;;  %v109_v12 = vld [vmem:[%s670_s0] sm:$0xff]  ;;  %v345_v14 = vsel %vm183_vm1, 1.0, %v563_v13  ;;  %v349_v16 = vsel %vm225_vm3, 1.0, %v563_v13  ;;  %v290_v18 = vld [vmem:[#allocation10 + $0x78] sm:$0xff] }
  0x1b   :  { %v346_v15 = vsel %vm184_vm2, 1.0, %v563_v13  ;;  %v350_v17 = vsel %vm226_vm4, 1.0, %v563_v13  ;;  %295 = vmatpush.msra.mxu2 %v290_v18  ;;  %353 = vmatpush.msra.mxu3 %v290_v18  ;;  %vm205_vm6 = vcmp.eq.s32.totalorder %v181_v9, 1  ;;  %vm246_vm7 = vcmp.eq.s32.totalorder %v180_v8, 3  ;;  %v289_v21 = vld [vmem:[#allocation10 + $0x70] sm:$0xff]  ;;  %v288_v22 = vld [vmem:[#allocation10 + $0x68] sm:$0xff] }
  0x1c   :  { %142 = vmatpush.msra.mxu0 %v118_v5  ;;  %171 = vmatpush.msra.mxu1 %v112_v6  ;;  %v380_v19 = vpack.i.bf16 %v346_v15, %v345_v14  ;;  %v391_v20 = vpack.i.bf16 %v350_v17, %v349_v16  ;;  %vm247_vm8 = vcmp.eq.s32.totalorder %v181_v9, 3  ;;  %v347_v23 = vsel %vm204_vm5, 1.0, %v563_v13  ;;  %v287_v27 = vld [vmem:[#allocation10 + $0x60] sm:$0xff]  ;;  %v116_v28 = vld [vmem:[#allocation2 + $0x8] sm:$0xff]  ;;  %v284_v34 = vld [vmem:[#allocation10 + $0x48] sm:$0xff] }
  0x1d   :  { %v348_v24 = vsel %vm205_vm6, 1.0, %v563_v13  ;;  %v351_v25 = vsel %vm246_vm7, 1.0, %v563_v13  ;;  %v352_v26 = vsel %vm247_vm8, 1.0, %v563_v13  ;;  %296 = vmatpush.msra.mxu2 %v289_v21  ;;  %354 = vmatpush.msra.mxu3 %v289_v21  ;;  %v110_v29 = vld [vmem:[%s670_s0 + $0x8] sm:$0xff]  ;;  %v283_v35 = vld [vmem:[#allocation10 + $0x40] sm:$0xff]  ;;  %v280_v38 = vld [vmem:[#allocation10 + $0x28] sm:$0xff] }
  0x1e   :  { %143 = vmatpush.msra.mxu0 %v117_v7  ;;  %172 = vmatpush.msra.mxu1 %v111_v10  ;;  %v385_v30 = vpack.i.bf16 %v348_v24, %v347_v23  ;;  %v396_v31 = vpack.i.bf16 %v352_v26, %v351_v25  ;;  %v286_v32 = vld [vmem:[#allocation10 + $0x58] sm:$0xff]  ;;  %v285_v33 = vld [vmem:[#allocation10 + $0x50] sm:$0xff]  ;;  %v279_v39 = vld [vmem:[#allocation10 + $0x20] sm:$0xff] }
  0x1f   :  { %341 = vmatmul.msk.f32.vlgmr.msra.gmra.mxu0 %vm121_vm0, %v115_v11  ;;  %343 = vmatmul.msk.f32.vlgmr.msra.gmra.mxu1 %vm121_vm0, %v109_v12  ;;  %v282_v36 = vld [vmem:[#allocation10 + $0x38] sm:$0xff]  ;;  %v281_v37 = vld [vmem:[#allocation10 + $0x30] sm:$0xff]  ;;  %v276_v42 = vld [vmem:[#allocation10 + $0x8] sm:$0xff] }
  0x20   :  { %381 = vperm.xlu0 %379, %v380_v19   ;;  %392 = vperm.xlu1 %390, %v391_v20   ;;  %v278_v40 = vld [vmem:[#allocation10 + $0x18] sm:$0xff]  ;;  %v277_v41 = vld [vmem:[#allocation10 + $0x10] sm:$0xff]  ;;  %v275_v43 = vld [vmem:[#allocation10] sm:$0xff] }
  0x21   :  { %297 = vmatpush.msra.mxu2 %v288_v22  ;;  %355 = vmatpush.msra.mxu3 %v288_v22  ;;  %v182_v46 = vld [vmem:[#allocation8] sm:$0xf]  ;;  %v401_v5 = vld [vmem:[%s676_s6] ss:$0 sm:$0xff] }
  0x22   :  { %v199_v47 = vperm.slane %v182_v46, 0  ;;  %v220_v49 = vperm.slane %v182_v46, 1  ;;  %v241_v53 = vperm.slane %v182_v46, 2  ;;  %v262_v60 = vperm.slane %v182_v46, 3  ;;  %v402_v24 = vld [vmem:[%s678_s8] ss:$0 sm:$0xff] }
  0x23   :  { %298 = vmatpush.msra.mxu2 %v287_v27  ;;  %356 = vmatpush.msra.mxu3 %v287_v27 }
  0x25   :  { %299 = vmatpush.msra.mxu2 %v286_v32  ;;  %357 = vmatpush.msra.mxu3 %v286_v32 }
  0x27   :  { %342 = vmatmul.msk.f32.gmra.mxu0 %vm121_vm0, %v116_v28  ;;  %344 = vmatmul.msk.f32.gmra.mxu1 %vm121_vm0, %v110_v29 }
  0x28   :  { %386 = vperm.xlu0 %379, %v385_v30   ;;  %397 = vperm.xlu1 %390, %v396_v31  }
  0x29   :  { %300 = vmatpush.msra.mxu2 %v285_v33  ;;  %358 = vmatpush.msra.mxu3 %v285_v33 }
  0x2b   :  { %301 = vmatpush.msra.mxu2 %v284_v34  ;;  %359 = vmatpush.msra.mxu3 %v284_v34 }
  0x2d   :  { %302 = vmatpush.msra.mxu2 %v283_v35  ;;  %360 = vmatpush.msra.mxu3 %v283_v35 }
  0x2f   :  { %303 = vmatpush.msra.mxu2 %v282_v36  ;;  %361 = vmatpush.msra.mxu3 %v282_v36 }
  0x31   :  { %304 = vmatpush.msra.mxu2 %v281_v37  ;;  %362 = vmatpush.msra.mxu3 %v281_v37 }
  0x33   :  { %305 = vmatpush.msra.mxu2 %v280_v38  ;;  %363 = vmatpush.msra.mxu3 %v280_v38 }
  0x35   :  { %306 = vmatpush.msra.mxu2 %v279_v39  ;;  %364 = vmatpush.msra.mxu3 %v279_v39 }
  0x37   :  { %307 = vmatpush.msra.mxu2 %v278_v40  ;;  %365 = vmatpush.msra.mxu3 %v278_v40 }
  0x39   :  { %308 = vmatpush.msra.mxu2 %v277_v41  ;;  %366 = vmatpush.msra.mxu3 %v277_v41 }
  0x3b   :  { %309 = vmatpush.msra.mxu2 %v276_v42  ;;  %367 = vmatpush.msra.mxu3 %v276_v42 }
  0x3d   :  { %310 = vmatpush.msra.mxu2 %v275_v43  ;;  %368 = vmatpush.msra.mxu3 %v275_v43 }
  0x92   :  { %v382_v44 = vpop.permute.xlu0 %381  ;;  %v393_v45 = vpop.permute.xlu1 %392 }
  0x93   :  { %v383_v48 = vunpack.i.l.bf16 %v382_v44  ;;  %v394_v54 = vunpack.i.l.bf16 %v393_v45  ;;  %v384_v0 = vunpack.i.h.bf16 %v382_v44  ;;  %v395_v9 = vunpack.i.h.bf16 %v393_v45 }
  0x95   :  { %v200_v52 = vmul.f32 %v383_v48, %v199_v47  ;;  %v242_v62 = vmul.f32 %v394_v54, %v241_v53  ;;  %v201_v8 = vmul.f32 %v384_v0, %v199_v47  ;;  %v243_v16 = vmul.f32 %v395_v9, %v241_v53 }
  0x9a   :  { %v387_v50 = vpop.permute.xlu0 %386  ;;  %v398_v51 = vpop.permute.xlu1 %397 }
  0x9b   :  { %v388_v55 = vunpack.i.l.bf16 %v387_v50  ;;  %v399_v61 = vunpack.i.l.bf16 %v398_v51  ;;  %v389_v3 = vunpack.i.h.bf16 %v387_v50  ;;  %v400_v13 = vunpack.i.h.bf16 %v398_v51 }
  0x9c   :  { %v145_v56 = vpop.f32.mrf.mxu0  ;;  %v174_v57 = vpop.f32.mrf.mxu1 }
  0x9d   :  { %v221_v58 = vmul.f32 %v388_v55, %v220_v49  ;;  %v175_v59 = vadd.f32 %v174_v57, %v145_v56  ;;  %v263_v2 = vmul.f32 %v399_v61, %v262_v60  ;;  %v222_v12 = vmul.f32 %v389_v3, %v220_v49 }
  0x9e   :  { %v264_v19 = vmul.f32 %v400_v13, %v262_v60 }
  0x9f   :  { %v202_v63 = vadd.f32 %v200_v52, %v175_v59 }
  0xa1   :  { %v223_v1 = vadd.f32 %v221_v58, %v202_v63 }
  0xa3   :  { %v244_v4 = vadd.f32 %v242_v62, %v223_v1 }
  0xa4   :  { %v148_v6 = vpop.f32.mrf.mxu0  ;;  %v177_v7 = vpop.f32.mrf.mxu1 }
  0xa5   :  { %v178_v10 = vadd.f32 %v177_v7, %v148_v6  ;;  %v265_v11 = vadd.f32 %v263_v2, %v244_v4 }
  0xa7   :  { %v203_v14 = vadd.f32 %v201_v8, %v178_v10  ;;  %v271_v15 = vadd.f32 %v401_v5, %v265_v11 }
  0xa9   :  { %v224_v17 = vadd.f32 %v222_v12, %v203_v14  ;;  %v273_v18 = vmax.f32 %v271_v15, 0.0 }
  0xab   :  { %311 = vmatmul.f32.vlgmr.msra.gmra.mxu2 %v273_v18  ;;  %v245_v20 = vadd.f32 %v243_v16, %v224_v17 }
  0xad   :  { %v266_v21 = vadd.f32 %v264_v19, %v245_v20 }
  0xaf   :  { %v272_v22 = vadd.f32 %v401_v5, %v266_v21 }
  0xb1   :  { %v274_v23 = vmax.f32 %v272_v22, 0.0 }
  0xb3   :  { %314 = vmatmul.f32.vlgmr.msra.gmra.mxu3 %v274_v23 }
 0x12e   :  { %v312_v25 = vpop.f32.mrf.mxu2 }
 0x12f   :  { %v313_v26 = vadd.f32 %v402_v24, %v312_v25 }
 0x131   :  { %318 = vst [vmem:[#allocation11] sm:$0xff] %v313_v26 }
 0x136   :  { %v315_v27 = vpop.f32.mrf.mxu3 }
 0x137   :  { %v316_v28 = vadd.f32 %v402_v24, %v315_v27 }
 0x139   :  { %319 = vst [vmem:[#allocation11 + $0x8] sm:$0xff] %v316_v28 }
 0x13a   :  { %332 = dma.vmem_to_hbm [thread:$0]  %s325_s22, 256, %s327_s24, [#allocation4], %s556_s17, %s556_s17, %s557_s18  }
 0x13b   :  { %553 = dma.done.wait [#allocation4], 256  }
 0x13c   :  { %554 = vsyncadd [#allocation4], 4294967040 }
 0x13d   :  { %337 = vsyncpa [#allocation3], 1 }
 0x13e   :  { %338 = vsyncpa [#allocation6], 1 }
 0x13f   :  { %339 = vsyncpa [#allocation9], 1 }
 0x140   :  { %340 = vsyncpa [#allocation4], 1 }

</bundles_post_ra>
